<compile_context>
chip_gen: v7x
topology: tpu7x:2x2x1
jax: 0.10.0
libtpu: 0.0.40
codegen_flags: <defaults>
</compile_context>

<pallas_src>
import functools

import jax
import jax.numpy as jnp
from jax.experimental import pallas as pl
from jax.experimental.pallas import tpu as pltpu


def _round_up(v, m):
    return (v + m - 1) // m * m


# --------------------------------------------------------------------------
# Fused single-pass kernel (small / medium N): everything in VMEM, one launch.
#   out[i] = adj[i, :] @ (x @ Wg') + x[i] @ Wl' + b'
# --------------------------------------------------------------------------
def _fused_kernel(x_all_ref, x_i_ref, adj_ref, wg_ref, wl_ref, b_ref, out_ref):
    # Projection of all rows (resident x block); recomputed per row tile, which
    # is cheap at the sizes this path is selected for and keeps the row axis
    # fully "parallel" for the v7x megacore.
    xw = jnp.dot(x_all_ref[...], wg_ref[...],
                 preferred_element_type=jnp.float32).astype(x_all_ref.dtype)
    agg = jnp.dot(adj_ref[...], xw, preferred_element_type=jnp.float32)
    nf = jnp.dot(x_i_ref[...], wl_ref[...],
                 preferred_element_type=jnp.float32) + b_ref[...]
    out_ref[...] = (agg + nf).astype(out_ref.dtype)


# --------------------------------------------------------------------------
# Two-pass path (large N).
# Pass 1: one 2*C_pad-wide projection:  [ x @ Wg'  |  x @ Wl' + b' ]
# --------------------------------------------------------------------------
def _project_kernel(x_ref, w_ref, b_ref, xw_ref):
    xw = jnp.dot(x_ref[...], w_ref[...], preferred_element_type=jnp.float32)
    xw_ref[...] = (xw + b_ref[...]).astype(xw_ref.dtype)


# Pass 2: out[i] = (sum_k adj[i,k] @ XW[k]) + NF[i]   (f32 accumulator over K)
def _aggregate_kernel(adj_ref, xwk_ref, nfi_ref, out_ref, acc_ref):
    k = pl.program_id(1)

    @pl.when(k == 0)
    def _():
        acc_ref[...] = jnp.zeros_like(acc_ref)

    acc_ref[...] += jnp.dot(adj_ref[...], xwk_ref[...],
                            preferred_element_type=jnp.float32)

    @pl.when(k == pl.num_programs(1) - 1)
    def _():
        out_ref[...] = (acc_ref[...]
                        + nfi_ref[...].astype(jnp.float32)).astype(out_ref.dtype)


@functools.partial(jax.jit,
                   static_argnames=("tile_n", "tile_k_max", "use_bf16",
                                    "allow_fused"))
def combined_model_vector(x, adj, w_gcn, b_gcn, w_lin, b_lin, beta, *,
                          tile_n=256, tile_k_max=2048, use_bf16=True,
                          allow_fused=True):
    N, F_in = x.shape
    C = w_gcn.shape[1]

    # ---- fold beta + biases into the weights (exact, done once per call) ----
    beta2 = beta.reshape(1, C).astype(jnp.float32)
    wg_f = w_gcn.astype(jnp.float32) * beta2
    wl_f = w_lin.astype(jnp.float32) * (1.0 - beta2)
    b_f = (beta2 * b_gcn.reshape(1, C).astype(jnp.float32)
           + (1.0 - beta2) * b_lin.reshape(1, C).astype(jnp.float32))

    # ---- padding / tiling choices ----
    C_pad = _round_up(max(C, 1), 128)
    mxu_dtype = jnp.bfloat16 if use_bf16 else jnp.float32
    itemsize = jnp.dtype(mxu_dtype).itemsize

    # Row tile: <= tile_n, multiple of 8.
    tile_m = min(tile_n, _round_up(N, 8))
    # Avoid gross over-padding when N is just above a tile boundary
    # (quadratic adj padding waste) -- shrink no further than 128.
    while tile_m > 128 and (_round_up(N, tile_m) - N) * 2 >= tile_m:
        tile_m = _round_up(tile_m // 2, 8)
    # Keep at least two row tiles so both v7x TensorCores get work.
    if N > 8 and _round_up(N, tile_m) // tile_m < 2:
        tile_m = min(tile_m, _round_up(-(-N // 2), 8))
    N_pad = _round_up(N, tile_m)
    n_row_tiles = N_pad // tile_m

    def pad2(a, r, c):
        return jnp.pad(a, ((0, r - a.shape[0]), (0, c - a.shape[1])))

    x_p = pad2(x.astype(jnp.float32), N_pad, F_in).astype(mxu_dtype)
    adj_p = pad2(adj.astype(jnp.float32), N_pad, N_pad).astype(mxu_dtype)
    wg_p = pad2(wg_f, F_in, C_pad).astype(mxu_dtype)
    wl_p = pad2(wl_f, F_in, C_pad).astype(mxu_dtype)
    b_p = pad2(b_f, 1, C_pad)                       # stays f32

    # ---- fused single-pass path for small / medium N -----------------------
    fused_vmem = (N_pad * F_in * itemsize            # resident x (all rows)
                  + 2 * tile_m * F_in * itemsize     # x row tile (2 buffers)
                  + 2 * tile_m * N_pad * itemsize    # adj row slab (2 buffers)
                  + 2 * F_in * C_pad * itemsize      # Wg', Wl'
                  + N_pad * C_pad * (4 + itemsize)   # in-kernel x@Wg'
                  + 2 * tile_m * C_pad * 4)          # out tile (2 buffers)
    use_fused = allow_fused and fused_vmem <= 12 * 1024 * 1024

    if use_fused:
        out_p = pl.pallas_call(
            _fused_kernel,
            out_shape=jax.ShapeDtypeStruct((N_pad, C_pad), jnp.float32),
            grid_spec=pltpu.PrefetchScalarGridSpec(
                num_scalar_prefetch=0,
                grid=(n_row_tiles,),
                in_specs=[
                    pl.BlockSpec((N_pad, F_in), lambda i: (0, 0)),    # x, all rows
                    pl.BlockSpec((tile_m, F_in), lambda i: (i, 0)),   # x, row tile
                    pl.BlockSpec((tile_m, N_pad), lambda i: (i, 0)),  # adj slab
                    pl.BlockSpec((F_in, C_pad), lambda i: (0, 0)),    # Wg'
                    pl.BlockSpec((F_in, C_pad), lambda i: (0, 0)),    # Wl'
                    pl.BlockSpec((1, C_pad), lambda i: (0, 0)),       # b'
                ],
                out_specs=pl.BlockSpec((tile_m, C_pad), lambda i: (i, 0)),
            ),
            compiler_params=pltpu.CompilerParams(
                dimension_semantics=("parallel",),
                vmem_limit_bytes=32 * 1024 * 1024),
        )(x_p, x_p, adj_p, wg_p, wl_p, b_p)
        return out_p[:N, :C]

    # ---- two-pass path (large N) -------------------------------------------
    # K tile for the aggregation: multiple of tile_m, as large as possible
    # (<= tile_k_max), must divide N_pad and keep the adj block lane-aligned
    # (multiple of 128) unless it covers the full K extent.
    max_kt = max(1, min(tile_k_max // tile_m, n_row_tiles))
    kt = n_row_tiles                       # fallback: single K tile (full dim)
    for cand in range(max_kt, 0, -1):
        if n_row_tiles % cand == 0 and (cand * tile_m) % 128 == 0:
            kt = cand
            break
    tile_k = kt * tile_m
    n_k_tiles = N_pad // tile_k

    # Pass 1: one 256-lane-wide projection  [ x@Wg' | x@Wl'+b' ]  (bf16 out).
    w_comb = jnp.concatenate([wg_p, wl_p], axis=1)                  # (F_in, 2*C_pad)
    b_comb = jnp.concatenate([jnp.zeros_like(b_p), b_p], axis=1)    # (1, 2*C_pad) f32

    xw_p = pl.pallas_call(
        _project_kernel,
        out_shape=jax.ShapeDtypeStruct((N_pad, 2 * C_pad), mxu_dtype),
        grid_spec=pltpu.PrefetchScalarGridSpec(
            num_scalar_prefetch=0,
            grid=(n_row_tiles,),
            in_specs=[
                pl.BlockSpec((tile_m, F_in), lambda i: (i, 0)),
                # Grid-invariant weight/bias blocks stay resident.
                pl.BlockSpec((F_in, 2 * C_pad), lambda i: (0, 0)),
                pl.BlockSpec((1, 2 * C_pad), lambda i: (0, 0)),
            ],
            out_specs=pl.BlockSpec((tile_m, 2 * C_pad), lambda i: (i, 0)),
        ),
        compiler_params=pltpu.CompilerParams(
            dimension_semantics=("parallel",),
            vmem_limit_bytes=32 * 1024 * 1024),
    )(x_p, w_comb, b_comb)

    # Pass 2: K-tiled adj @ XW with f32 accumulator; NF half added at finalize.
    out_p = pl.pallas_call(
        _aggregate_kernel,
        out_shape=jax.ShapeDtypeStruct((N_pad, C_pad), jnp.float32),
        grid_spec=pltpu.PrefetchScalarGridSpec(
            num_scalar_prefetch=0,
            grid=(n_row_tiles, n_k_tiles),        # (row tiles, K tiles)
            in_specs=[
                pl.BlockSpec((tile_m, tile_k), lambda i, k: (i, k)),   # adj
                pl.BlockSpec((tile_k, C_pad), lambda i, k: (k, 0)),    # x@Wg' (K stream)
                pl.BlockSpec((tile_m, C_pad), lambda i, k: (i, 1)),    # x@Wl'+b' (k-invariant)
            ],
            out_specs=pl.BlockSpec((tile_m, C_pad), lambda i, k: (i, 0)),
            scratch_shapes=[pltpu.VMEM((tile_m, C_pad), jnp.float32)],
        ),
        compiler_params=pltpu.CompilerParams(
            dimension_semantics=("parallel", "arbitrary"),
            vmem_limit_bytes=32 * 1024 * 1024),
    )(adj_p, xw_p, xw_p)

    return out_p[:N, :C]


def reference_forward(x, adj, w_gcn, b_gcn, w_lin, b_lin, beta):
    gcn = adj @ (x @ w_gcn) + b_gcn
    nf = x @ w_lin + b_lin
    return beta * gcn + (1.0 - beta) * nf


if __name__ == "__main__":
    # Small but tile-exercising shapes: 512 nodes, 128 input feats, 16 channels
    # (C=16 is zero-padded to 128 lanes inside the wrapper and sliced back).
    N, F_IN, C = 512, 128, 16

    key = jax.random.PRNGKey(0)
    k_x, k_a, k_wg, k_bg, k_wl, k_bl = jax.random.split(key, 6)

    x = jax.random.normal(k_x, (N, F_IN), dtype=jnp.float32)

    # Symmetric normalized adjacency with self-loops: D^-1/2 (A + I) D^-1/2
    a_rand = (jax.random.uniform(k_a, (N, N)) > 0.7).astype(jnp.float32)
    a_sym = jnp.clip(a_rand + a_rand.T, 0.0, 1.0) + jnp.eye(N, dtype=jnp.float32)
    deg = jnp.sum(a_sym, axis=1)
    d_inv_sqrt = 1.0 / jnp.sqrt(deg)
    adj = d_inv_sqrt[:, None] * a_sym * d_inv_sqrt[None, :]

    # Deterministic sub-model parameters.
    w_gcn = jax.random.normal(k_wg, (F_IN, C), dtype=jnp.float32) * 0.1
    b_gcn = jax.random.normal(k_bg, (1, C), dtype=jnp.float32) * 0.1
    w_lin = jax.random.normal(k_wl, (F_IN, C), dtype=jnp.float32) * 0.1
    b_lin = jax.random.normal(k_bl, (1, C), dtype=jnp.float32) * 0.1

    # nn.Parameter(torch.full((out_channels,), 0.5))
    beta = jnp.full((C,), 0.5, dtype=jnp.float32)

    ref = reference_forward(x, adj, w_gcn, b_gcn, w_lin, b_lin, beta)

    # Default path (fused single-pass kernel at this size).
    out_fused = combined_model_vector(x, adj, w_gcn, b_gcn, w_lin, b_lin, beta)
    out_fused = jax.block_until_ready(out_fused)

    # Also exercise the large-N two-pass path on the same inputs.
    out_2pass = combined_model_vector(x, adj, w_gcn, b_gcn, w_lin, b_lin, beta,
                                      allow_fused=False)
    out_2pass = jax.block_until_ready(out_2pass)

    assert out_fused.shape == (N, C)
    assert out_2pass.shape == (N, C)
    # bf16 MXU operands with f32 accumulation -> relaxed tolerance vs f32 ref.
    assert jnp.allclose(out_fused, ref, atol=5e-2, rtol=5e-2), "fused path mismatch"
    assert jnp.allclose(out_2pass, ref, atol=5e-2, rtol=5e-2), "two-pass mismatch"

    print("KERNEL_OK")
</pallas_src>

<mosaic_0001>
module attributes {stable_mosaic.version = 11 : i64} {
  func.func @_fused_kernel(%arg0: i32, %arg1: memref<512x128xbf16, #tpu.memory_space<vmem>>, %arg2: memref<256x128xbf16, #tpu.memory_space<vmem>>, %arg3: memref<256x512xbf16, #tpu.memory_space<vmem>>, %arg4: memref<128x128xbf16, #tpu.memory_space<vmem>>, %arg5: memref<128x128xbf16, #tpu.memory_space<vmem>>, %arg6: memref<1x128xf32, #tpu.memory_space<vmem>>, %arg7: memref<256x128xf32, #tpu.memory_space<vmem>>) attributes {dimension_semantics = [#tpu.dimension_semantics<parallel>], iteration_bounds = array<i64: 2>, scalar_prefetch = 0 : i64, scratch_operands = 0 : i64, tpu.core_type = #tpu.core_type<tc>, window_params = [{pipeline_mode = #tpu.pipeline_mode<synchronous>, transform_indices = @transform_0, window_bounds = array<i64: 512, 128>}, {transform_indices = @transform_1, window_bounds = array<i64: 256, 128>}, {transform_indices = @transform_2, window_bounds = array<i64: 256, 512>}, {pipeline_mode = #tpu.pipeline_mode<synchronous>, transform_indices = @transform_3, window_bounds = array<i64: 128, 128>}, {pipeline_mode = #tpu.pipeline_mode<synchronous>, transform_indices = @transform_4, window_bounds = array<i64: 128, 128>}, {pipeline_mode = #tpu.pipeline_mode<synchronous>, transform_indices = @transform_5, window_bounds = array<i64: 1, 128>}, {transform_indices = @transform_6, window_bounds = array<i64: 256, 128>}]} {
    %c0 = arith.constant 0 : index
    %c0_0 = arith.constant 0 : index
    %0 = vector.load %arg1[%c0, %c0_0] : memref<512x128xbf16, #tpu.memory_space<vmem>>, vector<512x128xbf16>
    %c0_1 = arith.constant 0 : index
    %c0_2 = arith.constant 0 : index
    %1 = vector.load %arg4[%c0_1, %c0_2] : memref<128x128xbf16, #tpu.memory_space<vmem>>, vector<128x128xbf16>
    %cst = arith.constant dense<0.000000e+00> : vector<512x128xf32>
    %2 = tpu.matmul %0, %1, %cst {dimension_numbers = #tpu.dot_dimension_numbers<[1], [0], [0], [1], [0, 0, 1, 1], [], []>} : vector<512x128xbf16>, vector<128x128xbf16>, vector<512x128xf32> -> vector<512x128xf32>
    %3 = arith.truncf %2 : vector<512x128xf32> to vector<512x128xbf16>
    %c0_3 = arith.constant 0 : index
    %c0_4 = arith.constant 0 : index
    %4 = vector.load %arg3[%c0_3, %c0_4] : memref<256x512xbf16, #tpu.memory_space<vmem>>, vector<256x512xbf16>
    %cst_5 = arith.constant dense<0.000000e+00> : vector<256x128xf32>
    %5 = tpu.matmul %4, %3, %cst_5 {dimension_numbers = #tpu.dot_dimension_numbers<[1], [0], [0], [1], [0, 0, 1, 1], [], []>} : vector<256x512xbf16>, vector<512x128xbf16>, vector<256x128xf32> -> vector<256x128xf32>
    %c0_6 = arith.constant 0 : index
    %c0_7 = arith.constant 0 : index
    %6 = vector.load %arg2[%c0_6, %c0_7] : memref<256x128xbf16, #tpu.memory_space<vmem>>, vector<256x128xbf16>
    %c0_8 = arith.constant 0 : index
    %c0_9 = arith.constant 0 : index
    %7 = vector.load %arg5[%c0_8, %c0_9] : memref<128x128xbf16, #tpu.memory_space<vmem>>, vector<128x128xbf16>
    %cst_10 = arith.constant dense<0.000000e+00> : vector<256x128xf32>
    %8 = tpu.matmul %6, %7, %cst_10 {dimension_numbers = #tpu.dot_dimension_numbers<[1], [0], [0], [1], [0, 0, 1, 1], [], []>} : vector<256x128xbf16>, vector<128x128xbf16>, vector<256x128xf32> -> vector<256x128xf32>
    %c0_11 = arith.constant 0 : index
    %c0_12 = arith.constant 0 : index
    %9 = vector.load %arg6[%c0_11, %c0_12] : memref<1x128xf32, #tpu.memory_space<vmem>>, vector<1x128xf32>
    %10 = vector.broadcast %9 : vector<1x128xf32> to vector<256x128xf32>
    %11 = arith.addf %8, %10 : vector<256x128xf32>
    %12 = arith.addf %5, %11 : vector<256x128xf32>
    %c0_13 = arith.constant 0 : index
    %c0_14 = arith.constant 0 : index
    %13 = vector.load %arg7[%c0_13, %c0_14] : memref<256x128xf32, #tpu.memory_space<vmem>>, vector<256x128xf32>
    tpu.vector_store %arg7[%c0_13, %c0_14], %12 {strides = array<i32>} : memref<256x128xf32, #tpu.memory_space<vmem>>, vector<256x128xf32>,
    return
  }
  func.func @transform_0(%arg0: i32) -> (i32, i32) {
    %c0_i32 = arith.constant 0 : i32
    %c0_i32_0 = arith.constant 0 : i32
    %c0_i32_1 = arith.constant 0 : i32
    return %c0_i32, %c0_i32_0 : i32, i32
  }
  func.func @transform_1(%arg0: i32) -> (i32, i32) {
    %c0_i32 = arith.constant 0 : i32
    %c0_i32_0 = arith.constant 0 : i32
    return %arg0, %c0_i32 : i32, i32
  }
  func.func @transform_2(%arg0: i32) -> (i32, i32) {
    %c0_i32 = arith.constant 0 : i32
    %c0_i32_0 = arith.constant 0 : i32
    return %arg0, %c0_i32 : i32, i32
  }
  func.func @transform_3(%arg0: i32) -> (i32, i32) {
    %c0_i32 = arith.constant 0 : i32
    %c0_i32_0 = arith.constant 0 : i32
    %c0_i32_1 = arith.constant 0 : i32
    return %c0_i32, %c0_i32_0 : i32, i32
  }
  func.func @transform_4(%arg0: i32) -> (i32, i32) {
    %c0_i32 = arith.constant 0 : i32
    %c0_i32_0 = arith.constant 0 : i32
    %c0_i32_1 = arith.constant 0 : i32
    return %c0_i32, %c0_i32_0 : i32, i32
  }
  func.func @transform_5(%arg0: i32) -> (i32, i32) {
    %c0_i32 = arith.constant 0 : i32
    %c0_i32_0 = arith.constant 0 : i32
    %c0_i32_1 = arith.constant 0 : i32
    return %c0_i32, %c0_i32_0 : i32, i32
  }
  func.func @transform_6(%arg0: i32) -> (i32, i32) {
    %c0_i32 = arith.constant 0 : i32
    %c0_i32_0 = arith.constant 0 : i32
    return %arg0, %c0_i32 : i32, i32
  }
}

</mosaic_0001>

<bundles_post_ra>
// kernel: combined_model_vector.1
= control target key start
LH: loop header
LB: loop body
LE: loop exit
PB: predicated region body
PF: predicated region fallthrough
CT: control target
= control target key end

     0   :  { %s2875_s21 = smov 0   ;;  %s3429_s0 = inlined_call_operand.vmem [shape: bf16[512,128], index: 0, kind: input, shape index: {}, may-alias: {0,1}]   ;;  %s3430_s1 = inlined_call_operand.vmem [shape: bf16[512,128], index: 1, kind: input, shape index: {}, may-alias: {0,1}]   ;;  %s3431_s2 = inlined_call_operand.vmem [shape: bf16[512,512], index: 2, kind: input, shape index: {}]   ;;  %s3432_s3 = inlined_call_operand.vmem [shape: bf16[128,128], index: 3, kind: input, shape index: {}]   ;;  %s3433_s4 = inlined_call_operand.vmem [shape: bf16[128,128], index: 4, kind: input, shape index: {}]   ;;  %s3434_s5 = inlined_call_operand.vmem [shape: f32[1,128], index: 5, kind: input, shape index: {}]   ;;  %s3435_s6 = inlined_call_operand.vmem [shape: f32[512,128], index: 6, kind: output, shape index: {}]  }
   0x1 LB: > { %s2088_s22 = sadd.s32 4294967295, %s2838_s21   ;;  %p2092_p0 = scmp.ge.s32.totalorder %s2838_s21, 1  ;;  %s2838_s21 = sphi %s2875_s21, %s16_s21  }
   0x2   : > { %p225_p1 = scmp.lt.s32.totalorder %s2838_s21, 3 }
   0x4   : > { %p226_p2 = pnand %p2092_p0, %p225_p1 }
   0x5   : > { %v2672_v0 = vld [vmem:[%s3432_s3] sm:$0xff] (!%p226_p2)   ;;  %v2673_v1 = vld [vmem:[%s3432_s3 + $0x8] sm:$0xff] (!%p226_p2)   ;;  %v2674_v2 = vld [vmem:[%s3432_s3 + $0x10] sm:$0xff] (!%p226_p2)   ;;  %s2093_s27 = sshll.u32 (!%p226_p2), %s2088_s22, 5 }
   0x6   : > { %229 = sbr.rel (%p226_p2) target bundleno = 690 (0x2b2), region = 44  ;;  %2520 = vmatprep.subr.bf16.mxu0 (!%p226_p2), %v2672_v0  ;;  %2648 = vmatprep.subr.bf16.mxu1 (!%p226_p2), %v2672_v0  ;;  %v2675_v3 = vld [vmem:[%s3432_s3 + $0x18] sm:$0xff] (!%p226_p2)   ;;  %v2680_v4 = vld [vmem:[%s3429_s0] sm:$0xff] (!%p226_p2)   ;;  %v2677_v6 = vld [vmem:[%s3432_s3 + $0x28] sm:$0xff] (!%p226_p2)   ;;  %p262_p3 = scmp.lt.s32.totalorder (!%p226_p2), %s2093_s27, 63 }
   0x7   : > { %2521 = vmatpush3.bf16.msra.mxu0 (!%p226_p2), %v2672_v0  ;;  %2656 = vmatpush3.bf16.msra.mxu1 (!%p226_p2), %v2672_v0  ;;  %v2676_v5 = vld [vmem:[%s3432_s3 + $0x20] sm:$0xff] (!%p226_p2)   ;;  %v2678_v7 = vld [vmem:[%s3432_s3 + $0x30] sm:$0xff] (!%p226_p2)   ;;  %v2679_v8 = vld [vmem:[%s3432_s3 + $0x38] sm:$0xff] (!%p226_p2)  }
   0x8   : > { %2522 = vmatprep.subr.bf16.mxu0 (!%p226_p2), %v2673_v1  ;;  %2649 = vmatprep.subr.bf16.mxu1 (!%p226_p2), %v2673_v1  ;;  %v2696_v9 = vld [vmem:[%s3429_s0 + $0xc0] sm:$0xff] (!%p226_p2)   ;;  %v2681_v10 = vld [vmem:[%s3429_s0 + $0x8] sm:$0xff] (!%p226_p2)   ;;  %v2682_v11 = vld [vmem:[%s3429_s0 + $0x10] sm:$0xff] (!%p226_p2)  }
   0x9   : > { %2536 = vmatprep.mubr.bf16.mxu0 (!%p226_p2), %v2680_v4  ;;  %2584 = vmatprep.mubr.bf16.mxu1 (!%p226_p2), %v2696_v9  ;;  %v2697_v12 = vld [vmem:[%s3429_s0 + $0xc8] sm:$0xff] (!%p226_p2)   ;;  %v2700_v13 = vld [vmem:[%s3429_s0 + $0xd0] sm:$0xff] (!%p226_p2)   ;;  %v2683_v14 = vld [vmem:[%s3429_s0 + $0x18] sm:$0xff] (!%p226_p2)  }
   0xa   : > { %v2684_v15 = vld [vmem:[%s3429_s0 + $0x20] sm:$0xff] (!%p226_p2)   ;;  %v2702_v16 = vld [vmem:[%s3429_s0 + $0xd8] sm:$0xff] (!%p226_p2)   ;;  %v2713_v19 = vld [vmem:[%s3433_s4 + $0x8] sm:$0xff] (!%p226_p2)  }
   0xb   : > { %2523 = vmatpush3.bf16.msra.mxu0 (!%p226_p2), %v2673_v1  ;;  %2657 = vmatpush3.bf16.msra.mxu1 (!%p226_p2), %v2673_v1  ;;  %v2704_v17 = vld [vmem:[%s3429_s0 + $0xe0] sm:$0xff] (!%p226_p2)   ;;  %v2685_v20 = vld [vmem:[%s3429_s0 + $0x28] sm:$0xff] (!%p226_p2)   ;;  %v2686_v21 = vld [vmem:[%s3429_s0 + $0x30] sm:$0xff] (!%p226_p2)  }
   0xc   : > { %2524 = vmatprep.subr.bf16.mxu0 (!%p226_p2), %v2674_v2  ;;  %2650 = vmatprep.subr.bf16.mxu1 (!%p226_p2), %v2674_v2  ;;  %v2712_v18 = vld [vmem:[%s3433_s4] sm:$0xff] (!%p226_p2)   ;;  %v2706_v22 = vld [vmem:[%s3429_s0 + $0xe8] sm:$0xff] (!%p226_p2)   ;;  %v2708_v23 = vld [vmem:[%s3429_s0 + $0xf0] sm:$0xff] (!%p226_p2)  }
   0xd   : > { %v2714_v24 = vld [vmem:[%s3433_s4 + $0x10] sm:$0xff]   ;;  %v2715_v25 = vld [vmem:[%s3433_s4 + $0x18] sm:$0xff]   ;;  %v2688_v28 = vld [vmem:[%s3429_s0 + $0x40] sm:$0xff]   ;;  %s3437_s27 = smov (!%p262_p3, %s2093_s27), 63 }
   0xe   : > { %v2687_v26 = vld [vmem:[%s3429_s0 + $0x38] sm:$0xff]   ;;  %v2716_v29 = vld [vmem:[%s3433_s4 + $0x20] sm:$0xff]   ;;  %v2717_v30 = vld [vmem:[%s3433_s4 + $0x28] sm:$0xff]   ;;  %s2094_s8 = sshll.u32 %s3437_s27, 2  ;;  %s2231_s11 = sshll.u32 %s3437_s27, 4 }
   0xf   : > { %2525 = vmatpush3.bf16.msra.mxu0 %v2674_v2  ;;  %2658 = vmatpush3.bf16.msra.mxu1 %v2674_v2  ;;  %v2710_v27 = vld [vmem:[%s3429_s0 + $0xf8] sm:$0xff]   ;;  %v2689_v31 = vld [vmem:[%s3429_s0 + $0x48] sm:$0xff]   ;;  %v2718_v32 = vld [vmem:[%s3433_s4 + $0x30] sm:$0xff]   ;;  %s3035_s22 = scalar_lea.vmem %s3430_s1, %s2094_s8  ;;  %s3057_s14 = scalar_lea.vmem %s3431_s2, %s2231_s11 }
  0x10   : > { %2526 = vmatprep.subr.bf16.mxu0 %v2675_v3  ;;  %2651 = vmatprep.subr.bf16.mxu1 %v2675_v3  ;;  %v2690_v33 = vld [vmem:[%s3429_s0 + $0x50] sm:$0xff]   ;;  %v2691_v34 = vld [vmem:[%s3429_s0 + $0x58] sm:$0xff]   ;;  %v2692_v35 = vld [vmem:[%s3429_s0 + $0x60] sm:$0xff]   ;;  %s2099_s17 = sshll.u32 %s3437_s27, 3 }
  0x11   : > { %v2693_v36 = vld [vmem:[%s3429_s0 + $0x68] sm:$0xff]   ;;  %v2694_v37 = vld [vmem:[%s3429_s0 + $0x70] sm:$0xff]   ;;  %v2695_v38 = vld [vmem:[%s3429_s0 + $0x78] sm:$0xff]   ;;  %s3304_s20 = scalar_lea.vmem %s3435_s6, %s2099_s17 }
  0x12   : > { %v2698_v39 = vld [vmem:[%s3429_s0 + $0x80] sm:$0xff]   ;;  %v2699_v40 = vld [vmem:[%s3429_s0 + $0x88] sm:$0xff]   ;;  %v2701_v41 = vld [vmem:[%s3429_s0 + $0x90] sm:$0xff]  }
  0x13   : > { %2527 = vmatpush3.bf16.msra.mxu0 %v2675_v3  ;;  %2659 = vmatpush3.bf16.msra.mxu1 %v2675_v3  ;;  %v2703_v42 = vld [vmem:[%s3429_s0 + $0x98] sm:$0xff]   ;;  %v2705_v43 = vld [vmem:[%s3429_s0 + $0xa0] sm:$0xff]   ;;  %v2707_v44 = vld [vmem:[%s3429_s0 + $0xa8] sm:$0xff]  }
  0x14   : > { %2528 = vmatprep.subr.bf16.mxu0 %v2676_v5  ;;  %2652 = vmatprep.subr.bf16.mxu1 %v2676_v5  ;;  %v2709_v45 = vld [vmem:[%s3429_s0 + $0xb0] sm:$0xff]   ;;  %v2719_v46 = vld [vmem:[%s3433_s4 + $0x38] sm:$0xff]   ;;  %v2720_v48 = vld [vmem:[%s3035_s22] sm:$0xff]  }
  0x15   : > { %v2711_v47 = vld [vmem:[%s3429_s0 + $0xb8] sm:$0xff]   ;;  %v2721_v49 = vld [vmem:[%s3035_s22 + $0x8] sm:$0xff]   ;;  %v2722_v50 = vld [vmem:[%s3035_s22 + $0x10] sm:$0xff]  }
  0x16   : > { %v2723_v51 = vld [vmem:[%s3035_s22 + $0x18] sm:$0xff]   ;;  %v2724_v52 = vld [vmem:[%s3035_s22 + $0x20] sm:$0xff]   ;;  %v2725_v53 = vld [vmem:[%s3035_s22 + $0x28] sm:$0xff]  }
  0x17   : > { %2529 = vmatpush3.bf16.msra.mxu0 %v2676_v5  ;;  %2660 = vmatpush3.bf16.msra.mxu1 %v2676_v5  ;;  %v2726_v54 = vld [vmem:[%s3035_s22 + $0x30] sm:$0xff]   ;;  %v2727_v55 = vld [vmem:[%s3035_s22 + $0x38] sm:$0xff]   ;;  %v2728_v56 = vld [vmem:[%s3035_s22 + $0x40] sm:$0xff]  }
  0x18   : > { %2530 = vmatprep.subr.bf16.mxu0 %v2677_v6  ;;  %2653 = vmatprep.subr.bf16.mxu1 %v2677_v6  ;;  %v2729_v57 = vld [vmem:[%s3035_s22 + $0x48] sm:$0xff]   ;;  %v2730_v58 = vld [vmem:[%s3035_s22 + $0x50] sm:$0xff]   ;;  %v2731_v59 = vld [vmem:[%s3035_s22 + $0x58] sm:$0xff]  }
  0x19   : > { %v2732_v60 = vld [vmem:[%s3035_s22 + $0x60] sm:$0xff]   ;;  %v2733_v61 = vld [vmem:[%s3035_s22 + $0x68] sm:$0xff]   ;;  %v2734_v62 = vld [vmem:[%s3035_s22 + $0x70] sm:$0xff]  }
  0x1a   : > { %v2735_v63 = vld [vmem:[%s3035_s22 + $0x78] sm:$0xff]   ;;  %v2738_v0 = vld [vmem:[%s3057_s14 + $0x4] ss:$16 sps:$4 sm:$0xff]  }
  0x1b   : > { %2531 = vmatpush3.bf16.msra.mxu0 %v2677_v6  ;;  %2661 = vmatpush3.bf16.msra.mxu1 %v2677_v6  ;;  %v2750_v1 = vld [vmem:[%s3057_s14 + $0xc] ss:$16 sps:$4 sm:$0xff]  }
  0x1c   : > { %2532 = vmatprep.subr.bf16.mxu0 %v2678_v7  ;;  %2654 = vmatprep.subr.bf16.mxu1 %v2678_v7 }
  0x1f   : > { %2533 = vmatpush3.bf16.msra.mxu0 %v2678_v7  ;;  %2662 = vmatpush3.bf16.msra.mxu1 %v2678_v7 }
  0x20   : > { %2534 = vmatprep.subr.bf16.mxu0 %v2679_v8  ;;  %2655 = vmatprep.subr.bf16.mxu1 %v2679_v8 }
  0x23   : > { %2535 = vmatpush3.bf16.msra.mxu0 %v2679_v8  ;;  %2663 = vmatpush3.bf16.msra.mxu1 %v2679_v8 }
  0x24   : > { %2600 = vmatprep.subr.bf16.mxu1 %v2712_v18 }
  0x26   : > { %2537 = vmatmul.mubr.bf16.vlgmr.msra.gmra.mrb[0].mxu0 %v2681_v10  ;;  %2585 = vmatmul.mubr.bf16.vlgmr.msra.gmra.mrb[0].mxu1 %v2697_v12 }
  0x27   : > { %2540 = vmatprep.mubr.bf16.mxu0 %v2682_v11  ;;  %2588 = vmatprep.mubr.bf16.mxu1 %v2700_v13 }
  0x28   : > { %2601 = vmatpush3.bf16.msra.mxu1 %v2712_v18 }
  0x29   : > { %2602 = vmatprep.subr.bf16.mxu1 %v2713_v19 }
  0x2c   : > { %2603 = vmatpush3.bf16.msra.mxu1 %v2713_v19 }
  0x2d   : > { %2604 = vmatprep.subr.bf16.mxu1 %v2714_v24 }
  0x2e   : > { %2541 = vmatmul.mubr.bf16.gmra.mrb[4].mxu0 %v2683_v14  ;;  %2589 = vmatmul.mubr.bf16.gmra.mrb[4].mxu1 %v2702_v16 }
  0x2f   : > { %2544 = vmatprep.mubr.bf16.mxu0 %v2684_v15  ;;  %2592 = vmatprep.mubr.bf16.mxu1 %v2704_v17 }
  0x30   : > { %2605 = vmatpush3.bf16.msra.mxu1 %v2714_v24 }
  0x31   : > { %2606 = vmatprep.subr.bf16.mxu1 %v2715_v25 }
  0x34   : > { %2607 = vmatpush3.bf16.msra.mxu1 %v2715_v25 }
  0x35   : > { %2608 = vmatprep.subr.bf16.mxu1 %v2716_v29 }
  0x36   : > { %2545 = vmatmul.mubr.bf16.gmra.mrb[8].mxu0 %v2685_v20  ;;  %2593 = vmatmul.mubr.bf16.gmra.mrb[8].mxu1 %v2706_v22 }
  0x37   : > { %2548 = vmatprep.mubr.bf16.mxu0 %v2686_v21  ;;  %2596 = vmatprep.mubr.bf16.mxu1 %v2708_v23 }
  0x38   : > { %2609 = vmatpush3.bf16.msra.mxu1 %v2716_v29 }
  0x39   : > { %2610 = vmatprep.subr.bf16.mxu1 %v2717_v30 }
  0x3c   : > { %2611 = vmatpush3.bf16.msra.mxu1 %v2717_v30 }
  0x3d   : > { %2612 = vmatprep.subr.bf16.mxu1 %v2718_v32 }
  0x3e   : > { %2549 = vmatmul.mubr.bf16.gmra.mrb[12].mxu0 %v2687_v26  ;;  %2597 = vmatmul.mubr.bf16.gmra.mrb[12].mxu1 %v2710_v27 }
  0x3f   : > { %2552 = vmatprep.mubr.bf16.mxu0 %v2688_v28  ;;  %2616 = vmatprep.mubr.bf16.mxu1 %v2720_v48 }
  0x40   : > { %2613 = vmatpush3.bf16.msra.mxu1 %v2718_v32 }
  0x41   : > { %2614 = vmatprep.subr.bf16.mxu1 %v2719_v46 }
  0x44   : > { %2615 = vmatpush3.bf16.msra.mxu1 %v2719_v46 }
  0x46   : > { %2553 = vmatmul.mubr.bf16.gmra.mrb[16].mxu0 %v2689_v31 }
  0x47   : > { %2556 = vmatprep.mubr.bf16.mxu0 %v2690_v33  ;;  %2617 = vmatmul.mubr.bf16.vlgmr.msra.gmra.mrb[16].mxu1 %v2721_v49 }
  0x48   : > { %2620 = vmatprep.mubr.bf16.mxu1 %v2722_v50 }
  0x4e   : > { %2557 = vmatmul.mubr.bf16.gmra.mrb[20].mxu0 %v2691_v34 }
  0x4f   : > { %2560 = vmatprep.mubr.bf16.mxu0 %v2692_v35  ;;  %2621 = vmatmul.mubr.bf16.gmra.mrb[20].mxu1 %v2723_v51 }
  0x50   : > { %2624 = vmatprep.mubr.bf16.mxu1 %v2724_v52 }
  0x56   : > { %2561 = vmatmul.mubr.bf16.gmra.mrb[24].mxu0 %v2693_v36 }
  0x57   : > { %2564 = vmatprep.mubr.bf16.mxu0 %v2694_v37  ;;  %2625 = vmatmul.mubr.bf16.gmra.mrb[24].mxu1 %v2725_v53 }
  0x58   : > { %2628 = vmatprep.mubr.bf16.mxu1 %v2726_v54 }
  0x5e   : > { %2565 = vmatmul.mubr.bf16.gmra.mrb[28].mxu0 %v2695_v38 }
  0x5f   : > { %2568 = vmatprep.mubr.bf16.mxu0 %v2698_v39  ;;  %2629 = vmatmul.mubr.bf16.gmra.mrb[28].mxu1 %v2727_v55 }
  0x60   : > { %2632 = vmatprep.mubr.bf16.mxu1 %v2728_v56 }
  0x66   : > { %2569 = vmatmul.mubr.bf16.gmra.mrb[32].mxu0 %v2699_v40 }
  0x67   : > { %2572 = vmatprep.mubr.bf16.mxu0 %v2701_v41  ;;  %2633 = vmatmul.mubr.bf16.gmra.mrb[32].mxu1 %v2729_v57 }
  0x68   : > { %2636 = vmatprep.mubr.bf16.mxu1 %v2730_v58 }
  0x6e   : > { %2573 = vmatmul.mubr.bf16.gmra.mrb[36].mxu0 %v2703_v42 }
  0x6f   : > { %2576 = vmatprep.mubr.bf16.mxu0 %v2705_v43  ;;  %2637 = vmatmul.mubr.bf16.gmra.mrb[36].mxu1 %v2731_v59 }
  0x70   : > { %2640 = vmatprep.mubr.bf16.mxu1 %v2732_v60 }
  0x76   : > { %2577 = vmatmul.mubr.bf16.gmra.mrb[40].mxu0 %v2707_v44 }
  0x77   : > { %2580 = vmatprep.mubr.bf16.mxu0 %v2709_v45  ;;  %2641 = vmatmul.mubr.bf16.gmra.mrb[40].mxu1 %v2733_v61 }
  0x78   : > { %2644 = vmatprep.mubr.bf16.mxu1 %v2734_v62 }
  0x7e   : > { %2581 = vmatmul.mubr.bf16.gmra.mrb[44].mxu0 %v2711_v47 }
  0x7f   : > { %2645 = vmatmul.mubr.bf16.gmra.mrb[44].mxu1 %v2735_v63  ;;  %1859 = vmatprep.mubr.bf16.mxu0 %v2750_v1 }
  0x80   : > { %1698 = vmatprep.mubr.bf16.mxu1 %v2738_v0 }
  0xf9   : > { %v3061_v2 = vpop.f32.mrb[0].mxu0  ;;  %v3063_v3 = vpop.f32.mrb[0].mxu1 }
  0xfa   : > { %v635_v4 = vpop.f32.mrb[1].mxu0  ;;  %v827_v5 = vpop.f32.mrb[1].mxu1 }
  0xfb   : > { %v2539_v6 = vpop.f32.mrb[2].mxu0  ;;  %v3065_v7 = vpop.f32.mrb[2].mxu1 }
  0xfc   : > { %v891_v8 = vpack.c.bf16 %v2539_v6, %v3061_v2  ;;  %v638_v9 = vpop.f32.mrb[3].mxu0  ;;  %v915_v10 = vpack.c.bf16 %v3065_v7, %v3063_v3  ;;  %v830_v11 = vpop.f32.mrb[3].mxu1 }
  0xfd   : > { %v890_v12 = vpack.c.bf16 %v638_v9, %v635_v4  ;;  %v914_v13 = vpack.c.bf16 %v830_v11, %v827_v5 }
  0xff   : > { %2408 = vmatprep.subr.bf16.mxu0 %v914_v13 }
 0x101   : > { %v2542_v14 = vpop.f32.mrb[4].mxu0  ;;  %v3070_v15 = vpop.f32.mrb[4].mxu1 }
 0x102   : > { %v651_v16 = vpop.f32.mrb[5].mxu0  ;;  %v3072_v17 = vpop.f32.mrb[5].mxu1 }
 0x103   : > { %v2543_v18 = vpop.f32.mrb[6].mxu0  ;;  %v3074_v19 = vpop.f32.mrb[6].mxu1 }
 0x104   : > { %v893_v20 = vpack.c.bf16 %v2543_v18, %v2542_v14  ;;  %v654_v21 = vpop.f32.mrb[7].mxu0  ;;  %v917_v22 = vpack.c.bf16 %v3074_v19, %v3070_v15  ;;  %v3078_v23 = vpop.f32.mrb[7].mxu1  ;;  %v2736_v18 = vld [vmem:[%s3057_s14] ss:$16 sps:$4 sm:$0xff]  }
 0x105   : > { %v892_v24 = vpack.c.bf16 %v654_v21, %v651_v16  ;;  %v916_v25 = vpack.c.bf16 %v3078_v23, %v3072_v17  ;;  %v2745_v17 = vld [vmem:[%s3057_s14 + $0x64] ss:$16 sps:$4 sm:$0xff]  }
 0x109   : > { %v2546_v26 = vpop.f32.mrb[8].mxu0  ;;  %v3082_v27 = vpop.f32.mrb[8].mxu1 }
 0x10a   : > { %v667_v28 = vpop.f32.mrb[9].mxu0  ;;  %v3084_v29 = vpop.f32.mrb[9].mxu1 }
 0x10b   : > { %v2547_v30 = vpop.f32.mrb[10].mxu0  ;;  %v3086_v31 = vpop.f32.mrb[10].mxu1 }
 0x10c   : > { %v895_v32 = vpack.c.bf16 %v2547_v30, %v2546_v26  ;;  %v670_v33 = vpop.f32.mrb[11].mxu0  ;;  %v919_v34 = vpack.c.bf16 %v3086_v31, %v3082_v27  ;;  %v3090_v35 = vpop.f32.mrb[11].mxu1 }
 0x10d   : > { %v894_v36 = vpack.c.bf16 %v670_v33, %v667_v28  ;;  %v918_v37 = vpack.c.bf16 %v3090_v35, %v3084_v29  ;;  %v2741_v33 = vld [vmem:[%s3057_s14 + $0x20] ss:$16 sps:$4 sm:$0xff]   ;;  %v2751_v35 = vld [vmem:[%s3057_s14 + $0x84] ss:$16 sps:$4 sm:$0xff]  }
 0x111   : > { %v2550_v38 = vpop.f32.mrb[12].mxu0  ;;  %v3094_v39 = vpop.f32.mrb[12].mxu1 }
 0x112   : > { %v683_v40 = vpop.f32.mrb[13].mxu0  ;;  %v3096_v41 = vpop.f32.mrb[13].mxu1 }
 0x113   : > { %v2551_v42 = vpop.f32.mrb[14].mxu0  ;;  %v3098_v43 = vpop.f32.mrb[14].mxu1 }
 0x114   : > { %v897_v44 = vpack.c.bf16 %v2551_v42, %v2550_v38  ;;  %v686_v45 = vpop.f32.mrb[15].mxu0  ;;  %v921_v46 = vpack.c.bf16 %v3098_v43, %v3094_v39  ;;  %v3102_v47 = vpop.f32.mrb[15].mxu1 }
 0x115   : > { %v896_v48 = vpack.c.bf16 %v686_v45, %v683_v40  ;;  %v920_v49 = vpack.c.bf16 %v3102_v47, %v3096_v41  ;;  %v2742_v40 = vld [vmem:[%s3057_s14 + $0x44] ss:$16 sps:$4 sm:$0xff]   ;;  %v2748_v47 = vld [vmem:[%s3057_s14 + $0x8] ss:$16 sps:$4 sm:$0xff]  }
 0x119   : > { %v2554_v50 = vpop.f32.mrb[16].mxu0 }
 0x11a   : > { %v699_v51 = vpop.f32.mrb[17].mxu0  ;;  %v3132_v27 = vpop.f32.mrb[16].mxu1 }
 0x11b   : > { %v2555_v52 = vpop.f32.mrb[18].mxu0  ;;  %v3134_v31 = vpop.f32.mrb[17].mxu1 }
 0x11c   : > { %v899_v53 = vpack.c.bf16 %v2555_v52, %v2554_v50  ;;  %v702_v54 = vpop.f32.mrb[19].mxu0  ;;  %v2754_v52 = vld [vmem:[%s3057_s14 + $0x2c] ss:$16 sps:$4 sm:$0xff]  }
 0x11d   : > { %v898_v55 = vpack.c.bf16 %v702_v54, %v699_v51  ;;  %v2753_v51 = vld [vmem:[%s3057_s14 + $0x80] ss:$16 sps:$4 sm:$0xff]   ;;  %v2756_v54 = vld [vmem:[%s3057_s14 + $0xa4] ss:$16 sps:$4 sm:$0xff]  }
 0x11f   : > { %2296 = vmatprep.subr.bf16.mxu1 %v898_v55 }
 0x120   : > { %2297 = vmatpush3.bf16.msra.mxu1 %v890_v12 }
 0x121   : > { %v2558_v56 = vpop.f32.mrb[20].mxu0  ;;  %2298 = vmatprep.subr.bf16.mxu1 %v899_v53 }
 0x122   : > { %v715_v57 = vpop.f32.mrb[21].mxu0 }
 0x123   : > { %v2559_v58 = vpop.f32.mrb[22].mxu0 }
 0x124   : > { %v901_v59 = vpack.c.bf16 %v2559_v58, %v2558_v56  ;;  %v718_v60 = vpop.f32.mrb[23].mxu0  ;;  %2299 = vmatpush3.bf16.msra.mxu1 %v891_v8  ;;  %v2759_v56 = vld [vmem:[%s3057_s14 + $0xa0] ss:$16 sps:$4 sm:$0xff]  }
 0x125   : > { %v900_v61 = vpack.c.bf16 %v718_v60, %v715_v57  ;;  %v2760_v57 = vld [vmem:[%s3057_s14 + $0x4c] ss:$16 sps:$4 sm:$0xff]  }
 0x127   : > { %2300 = vmatprep.subr.bf16.mxu1 %v900_v61 }
 0x128   : > { %2301 = vmatpush3.bf16.msra.mxu1 %v892_v24  ;;  %v2739_v24 = vld [vmem:[%s3057_s14 + $0x24] ss:$16 sps:$4 sm:$0xff]  }
 0x129   : > { %v2562_v62 = vpop.f32.mrb[24].mxu0  ;;  %2302 = vmatprep.subr.bf16.mxu1 %v901_v59  ;;  %v2762_v59 = vld [vmem:[%s3057_s14 + $0xc4] ss:$16 sps:$4 sm:$0xff]  }
 0x12a   : > { %v731_v63 = vpop.f32.mrb[25].mxu0 }
 0x12b   : > { %v2563_v0 = vpop.f32.mrb[26].mxu0 }
 0x12c   : > { %v903_v1 = vpack.c.bf16 %v2563_v0, %v2562_v62  ;;  %v734_v2 = vpop.f32.mrb[27].mxu0  ;;  %2303 = vmatpush3.bf16.msra.mxu1 %v893_v20  ;;  %v2764_v62 = vld [vmem:[%s3057_s14 + $0x48] ss:$16 sps:$4 sm:$0xff]   ;;  %v2765_v0 = vld [vmem:[%s3057_s14 + $0xc0] ss:$16 sps:$4 sm:$0xff]  }
 0x12d   : > { %v902_v4 = vpack.c.bf16 %v734_v2, %v731_v63 }
 0x12f   : > { %2304 = vmatprep.subr.bf16.mxu1 %v902_v4  ;;  %v2768_v4 = vld [vmem:[%s3057_s14 + $0xe4] ss:$16 sps:$4 sm:$0xff]  }
 0x130   : > { %2305 = vmatpush3.bf16.msra.mxu1 %v894_v36 }
 0x131   : > { %v2566_v5 = vpop.f32.mrb[28].mxu0  ;;  %2306 = vmatprep.subr.bf16.mxu1 %v903_v1  ;;  %v2766_v1 = vld [vmem:[%s3057_s14 + $0x6c] ss:$16 sps:$4 sm:$0xff]  }
 0x132   : > { %v747_v6 = vpop.f32.mrb[29].mxu0 }
 0x133   : > { %v2567_v9 = vpop.f32.mrb[30].mxu0 }
 0x134   : > { %v905_v8 = vpack.c.bf16 %v2567_v9, %v2566_v5  ;;  %v750_v11 = vpop.f32.mrb[31].mxu0  ;;  %2307 = vmatpush3.bf16.msra.mxu1 %v895_v32  ;;  %v2770_v9 = vld [vmem:[%s3057_s14 + $0x68] ss:$16 sps:$4 sm:$0xff]  }
 0x135   : > { %v904_v12 = vpack.c.bf16 %v750_v11, %v747_v6 }
 0x137   : > { %2308 = vmatprep.subr.bf16.mxu1 %v904_v12  ;;  %v2771_v12 = vld [vmem:[%s3057_s14 + $0xe0] ss:$16 sps:$4 sm:$0xff]  }
 0x138   : > { %2309 = vmatpush3.bf16.msra.mxu1 %v896_v48 }
 0x139   : > { %v2570_v13 = vpop.f32.mrb[32].mxu0  ;;  %2310 = vmatprep.subr.bf16.mxu1 %v905_v8  ;;  %v3183_v8 = vld [vmem:[%s3434_s5] ss:$0 sm:$0xff] }
 0x13a   : > { %v763_v14 = vpop.f32.mrb[33].mxu0 }
 0x13b   : > { %v2571_v16 = vpop.f32.mrb[34].mxu0 }
 0x13c   : > { %v907_v20 = vpack.c.bf16 %v2571_v16, %v2570_v13  ;;  %v766_v21 = vpop.f32.mrb[35].mxu0  ;;  %2311 = vmatpush3.bf16.msra.mxu1 %v897_v44  ;;  %v2744_v44 = vld [vmem:[%s3057_s14 + $0x40] ss:$16 sps:$4 sm:$0xff]   ;;  %v2772_v13 = vld [vmem:[%s3057_s14 + $0x8c] ss:$16 sps:$4 sm:$0xff]  }
 0x13d   : > { %v906_v26 = vpack.c.bf16 %v766_v21, %v763_v14 }
 0x13f   : > { %1699 = vmatmul.mubr.bf16.vlgmr.msra.gmra.mrb[48].mxu1 %v2736_v18  ;;  %2409 = vmatpush3.bf16.msra.mxu0 %v906_v26  ;;  %v2774_v18 = vld [vmem:[%s3057_s14 + $0x104] ss:$16 sps:$4 sm:$0xff]  }
 0x140   : > { %2410 = vmatprep.subr.bf16.mxu0 %v915_v10  ;;  %1706 = vmatprep.mubr.bf16.mxu1 %v2739_v24 }
 0x141   : > { %v2574_v28 = vpop.f32.mrb[36].mxu0 }
 0x142   : > { %v779_v30 = vpop.f32.mrb[37].mxu0 }
 0x143   : > { %v2575_v32 = vpop.f32.mrb[38].mxu0  ;;  %2411 = vmatpush3.bf16.msra.mxu0 %v907_v20 }
 0x144   : > { %v909_v36 = vpack.c.bf16 %v2575_v32, %v2574_v28  ;;  %v782_v38 = vpop.f32.mrb[39].mxu0  ;;  %2412 = vmatprep.subr.bf16.mxu0 %v916_v25  ;;  %v2747_v25 = vld [vmem:[%s3057_s14 + $0x60] ss:$16 sps:$4 sm:$0xff]  }
 0x145   : > { %v908_v42 = vpack.c.bf16 %v782_v38, %v779_v30  ;;  %v2776_v30 = vld [vmem:[%s3057_s14 + $0x88] ss:$16 sps:$4 sm:$0xff]  }
 0x147   : > { %1707 = vmatmul.mubr.bf16.gmra.mrb[52].mxu1 %v2741_v33  ;;  %2413 = vmatpush3.bf16.msra.mxu0 %v908_v42  ;;  %v2777_v33 = vld [vmem:[%s3057_s14 + $0x100] ss:$16 sps:$4 sm:$0xff]   ;;  %v2780_v42 = vld [vmem:[%s3057_s14 + $0x124] ss:$16 sps:$4 sm:$0xff]  }
 0x148   : > { %2414 = vmatprep.subr.bf16.mxu0 %v917_v22  ;;  %1714 = vmatprep.mubr.bf16.mxu1 %v2742_v40 }
 0x149   : > { %v2578_v3 = vpop.f32.mrb[40].mxu0 }
 0x14a   : > { %v795_v7 = vpop.f32.mrb[41].mxu0 }
 0x14b   : > { %v2579_v10 = vpop.f32.mrb[42].mxu0  ;;  %2415 = vmatpush3.bf16.msra.mxu0 %v909_v36  ;;  %v2778_v36 = vld [vmem:[%s3057_s14 + $0xac] ss:$16 sps:$4 sm:$0xff]  }
 0x14c   : > { %v911_v45 = vpack.c.bf16 %v2579_v10, %v2578_v3  ;;  %v798_v48 = vpop.f32.mrb[43].mxu0  ;;  %2416 = vmatprep.subr.bf16.mxu0 %v918_v37 }
 0x14d   : > { %v910_v23 = vpack.c.bf16 %v798_v48, %v795_v7  ;;  %v2782_v48 = vld [vmem:[%s3057_s14 + $0xa8] ss:$16 sps:$4 sm:$0xff]  }
 0x14f   : > { %1715 = vmatmul.mubr.bf16.gmra.mrb[56].mxu1 %v2744_v44  ;;  %2417 = vmatpush3.bf16.msra.mxu0 %v910_v23  ;;  %v2783_v23 = vld [vmem:[%s3057_s14 + $0x120] ss:$16 sps:$4 sm:$0xff]  }
 0x150   : > { %2418 = vmatprep.subr.bf16.mxu0 %v919_v34  ;;  %1722 = vmatprep.mubr.bf16.mxu1 %v2745_v17  ;;  %v3139_v34 = vpop.f32.mrb[18].mxu1 }
 0x151   : > { %v2582_v15 = vpop.f32.mrb[44].mxu0  ;;  %v3141_v41 = vpop.f32.mrb[19].mxu1 }
 0x152   : > { %v811_v19 = vpop.f32.mrb[45].mxu0 }
 0x153   : > { %v2583_v22 = vpop.f32.mrb[46].mxu0  ;;  %2419 = vmatpush3.bf16.msra.mxu0 %v911_v45 }
 0x154   : > { %v913_v50 = vpack.c.bf16 %v2583_v22, %v2582_v15  ;;  %v814_v29 = vpop.f32.mrb[47].mxu0  ;;  %2420 = vmatprep.subr.bf16.mxu0 %v920_v49  ;;  %v3144_v49 = vpop.f32.mrb[20].mxu1  ;;  %v2784_v15 = vld [vmem:[%s3057_s14 + $0xcc] ss:$16 sps:$4 sm:$0xff]  }
 0x155   : > { %v912_v37 = vpack.c.bf16 %v814_v29, %v811_v19  ;;  %v3148_v53 = vpop.f32.mrb[21].mxu1 }
 0x156   : > { %v3151_v39 = vpop.f32.mrb[22].mxu1 }
 0x157   : > { %1723 = vmatmul.mubr.bf16.gmra.mrb[60].mxu1 %v2747_v25  ;;  %2421 = vmatpush3.bf16.msra.mxu0 %v912_v37  ;;  %v3153_v43 = vpop.f32.mrb[23].mxu1  ;;  %v2786_v25 = vld [vmem:[%s3057_s14 + $0x144] ss:$16 sps:$4 sm:$0xff]  }
 0x158   : > { %2422 = vmatprep.subr.bf16.mxu0 %v921_v46  ;;  %1730 = vmatprep.mubr.bf16.mxu1 %v2751_v35  ;;  %v2758_v46 = vld [vmem:[%s3057_s14 + $0x28] ss:$16 sps:$4 sm:$0xff]   ;;  %v3156_v55 = vpop.f32.mrb[24].mxu1 }
 0x159   : > { %v3160_v58 = vpop.f32.mrb[25].mxu1 }
 0x15a   : > { %v3163_v60 = vpop.f32.mrb[26].mxu1 }
 0x15b   : > { %2423 = vmatpush3.bf16.msra.mxu0 %v913_v50  ;;  %v3165_v61 = vpop.f32.mrb[27].mxu1 }
 0x15c   : > { %v3168_v63 = vpop.f32.mrb[28].mxu1 }
 0x15d   : > { %v3172_v2 = vpop.f32.mrb[29].mxu1 }
 0x15e   : > { %1860 = vmatmul.mubr.bf16.vlgmr.msra.gmra.mrb[48].mxu0 %v2748_v47  ;;  %v3175_v5 = vpop.f32.mrb[30].mxu1 }
 0x15f   : > { %1731 = vmatmul.mubr.bf16.gmra.mrb[64].mxu1 %v2753_v51  ;;  %1867 = vmatprep.mubr.bf16.mxu0 %v2754_v52  ;;  %v3177_v6 = vpop.f32.mrb[31].mxu1  ;;  %v2788_v51 = vld [vmem:[%s3057_s14 + $0xc8] ss:$16 sps:$4 sm:$0xff]  }
 0x160   : > { %1738 = vmatprep.mubr.bf16.mxu1 %v2756_v54  ;;  %v2634_v11 = vpop.f32.mrb[32].mxu1  ;;  %v2789_v54 = vld [vmem:[%s3057_s14 + $0x140] ss:$16 sps:$4 sm:$0xff]  }
 0x161   : > { %v3188_v14 = vadd.f32 %v2634_v11, %v3183_v8  ;;  %v1283_v16 = vpop.f32.mrb[33].mxu1  ;;  %v2794_v11 = vld [vmem:[%s3057_s14 + $0xe8] ss:$16 sps:$4 sm:$0xff]  }
 0x162   : > { %v3192_v20 = vadd.f32 %v3183_v8, %v1283_v16  ;;  %v2635_v21 = vpop.f32.mrb[34].mxu1  ;;  %v2798_v16 = vld [vmem:[%s3057_s14 + $0x184] ss:$16 sps:$4 sm:$0xff]  }
 0x163   : > { %v3195_v24 = vadd.f32 %v2635_v21, %v3183_v8  ;;  %v1286_v26 = vpop.f32.mrb[35].mxu1  ;;  %v2801_v21 = vld [vmem:[%s3057_s14 + $0x180] ss:$16 sps:$4 sm:$0xff]  }
 0x164   : > { %v3198_v28 = vadd.f32 %v3183_v8, %v1286_v26  ;;  %v2638_v32 = vpop.f32.mrb[36].mxu1  ;;  %v2802_v26 = vld [vmem:[%s3057_s14 + $0x12c] ss:$16 sps:$4 sm:$0xff]  }
 0x165   : > { %v3204_v38 = vadd.f32 %v2638_v32, %v3183_v8  ;;  %v1299_v40 = vpop.f32.mrb[37].mxu1  ;;  %v2806_v32 = vld [vmem:[%s3057_s14 + $0x128] ss:$16 sps:$4 sm:$0xff]  }
 0x166   : > { %1868 = vmatmul.mubr.bf16.gmra.mrb[52].mxu0 %v2758_v46  ;;  %v3208_v3 = vadd.f32 %v3183_v8, %v1299_v40  ;;  %v2639_v7 = vpop.f32.mrb[38].mxu1  ;;  %v2790_v46 = vld [vmem:[%s3057_s14 + $0xec] ss:$16 sps:$4 sm:$0xff]   ;;  %v2810_v40 = vld [vmem:[%s3057_s14 + $0x1c4] ss:$16 sps:$4 sm:$0xff]  }
 0x167   : > { %1739 = vmatmul.mubr.bf16.gmra.mrb[68].mxu1 %v2759_v56  ;;  %1875 = vmatprep.mubr.bf16.mxu0 %v2760_v57  ;;  %v3211_v10 = vadd.f32 %v2639_v7, %v3183_v8  ;;  %v1302_v44 = vpop.f32.mrb[39].mxu1  ;;  %v2813_v7 = vld [vmem:[%s3057_s14 + $0x1c0] ss:$16 sps:$4 sm:$0xff]  }
 0x168   : > { %1746 = vmatprep.mubr.bf16.mxu1 %v2762_v59  ;;  %v3214_v45 = vadd.f32 %v3183_v8, %v1302_v44  ;;  %v2642_v17 = vpop.f32.mrb[40].mxu1  ;;  %v2792_v59 = vld [vmem:[%s3057_s14 + $0x164] ss:$16 sps:$4 sm:$0xff]   ;;  %v2814_v44 = vld [vmem:[%s3057_s14 + $0x16c] ss:$16 sps:$4 sm:$0xff]  }
 0x169   : > { %v3220_v19 = vadd.f32 %v2642_v17, %v3183_v8  ;;  %v1315_v22 = vpop.f32.mrb[41].mxu1  ;;  %v2818_v17 = vld [vmem:[%s3057_s14 + $0x168] ss:$16 sps:$4 sm:$0xff]  }
 0x16a   : > { %v3224_v50 = vadd.f32 %v3183_v8, %v1315_v22  ;;  %v2643_v29 = vpop.f32.mrb[42].mxu1  ;;  %v2822_v22 = vld [vmem:[%s3057_s14 + $0x188] ss:$16 sps:$4 sm:$0xff]  }
 0x16b   : > { %v3227_v35 = vadd.f32 %v2643_v29, %v3183_v8  ;;  %v1318_v37 = vpop.f32.mrb[43].mxu1  ;;  %v2825_v29 = vld [vmem:[%s3057_s14 + $0x1a8] ss:$16 sps:$4 sm:$0xff]  }
 0x16c   : > { %v3230_v47 = vadd.f32 %v3183_v8, %v1318_v37  ;;  %v2646_v52 = vpop.f32.mrb[44].mxu1  ;;  %v2826_v37 = vld [vmem:[%s3057_s14 + $0x1cc] ss:$16 sps:$4 sm:$0xff]  }
 0x16d   : > { %v3236_v56 = vadd.f32 %v2646_v52, %v3183_v8  ;;  %v1331_v57 = vpop.f32.mrb[45].mxu1  ;;  %v2829_v52 = vld [vmem:[%s3057_s14 + $0x1ec] ss:$16 sps:$4 sm:$0xff]  }
 0x16e   : > { %1876 = vmatmul.mubr.bf16.gmra.mrb[56].mxu0 %v2764_v62  ;;  %v3240_v62 = vadd.f32 %v3183_v8, %v1331_v57 }
 0x16f   : > { %1747 = vmatmul.mubr.bf16.gmra.mrb[72].mxu1 %v2765_v0  ;;  %1883 = vmatprep.mubr.bf16.mxu0 %v2766_v1  ;;  %v2647_v0 = vpop.f32.mrb[46].mxu1 }
 0x170   : > { %1754 = vmatprep.mubr.bf16.mxu1 %v2768_v4  ;;  %v3243_v1 = vadd.f32 %v2647_v0, %v3183_v8  ;;  %v1334_v4 = vpop.f32.mrb[47].mxu1 }
 0x176   : > { %1884 = vmatmul.mubr.bf16.gmra.mrb[60].mxu0 %v2770_v9  ;;  %v3246_v9 = vadd.f32 %v3183_v8, %v1334_v4 }
 0x177   : > { %1755 = vmatmul.mubr.bf16.gmra.mrb[76].mxu1 %v2771_v12  ;;  %1891 = vmatprep.mubr.bf16.mxu0 %v2772_v13  ;;  %v2795_v12 = vld [vmem:[%s3057_s14 + $0x160] ss:$16 sps:$4 sm:$0xff]   ;;  %v2796_v13 = vld [vmem:[%s3057_s14 + $0x10c] ss:$16 sps:$4 sm:$0xff]  }
 0x178   : > { %1762 = vmatprep.mubr.bf16.mxu1 %v2774_v18  ;;  %v2800_v18 = vld [vmem:[%s3057_s14 + $0x108] ss:$16 sps:$4 sm:$0xff]  }
 0x17e   : > { %1892 = vmatmul.mubr.bf16.gmra.mrb[64].mxu0 %v2776_v30  ;;  %v2804_v30 = vld [vmem:[%s3057_s14 + $0x1a4] ss:$16 sps:$4 sm:$0xff]  }
 0x17f   : > { %1763 = vmatmul.mubr.bf16.gmra.mrb[80].mxu1 %v2777_v33  ;;  %1899 = vmatprep.mubr.bf16.mxu0 %v2778_v36  ;;  %v2807_v33 = vld [vmem:[%s3057_s14 + $0x1a0] ss:$16 sps:$4 sm:$0xff]   ;;  %v2808_v36 = vld [vmem:[%s3057_s14 + $0x14c] ss:$16 sps:$4 sm:$0xff]  }
 0x180   : > { %1770 = vmatprep.mubr.bf16.mxu1 %v2780_v42  ;;  %v2812_v42 = vld [vmem:[%s3057_s14 + $0x148] ss:$16 sps:$4 sm:$0xff]  }
 0x186   : > { %1900 = vmatmul.mubr.bf16.gmra.mrb[68].mxu0 %v2782_v48  ;;  %v2816_v48 = vld [vmem:[%s3057_s14 + $0x1e4] ss:$16 sps:$4 sm:$0xff]  }
 0x187   : > { %1771 = vmatmul.mubr.bf16.gmra.mrb[84].mxu1 %v2783_v23  ;;  %1907 = vmatprep.mubr.bf16.mxu0 %v2784_v15  ;;  %v2819_v23 = vld [vmem:[%s3057_s14 + $0x1e0] ss:$16 sps:$4 sm:$0xff]   ;;  %v2820_v15 = vld [vmem:[%s3057_s14 + $0x18c] ss:$16 sps:$4 sm:$0xff]  }
 0x188   : > { %1778 = vmatprep.mubr.bf16.mxu1 %v2786_v25  ;;  %v2823_v25 = vld [vmem:[%s3057_s14 + $0x1ac] ss:$16 sps:$4 sm:$0xff]  }
 0x18e   : > { %1908 = vmatmul.mubr.bf16.gmra.mrb[72].mxu0 %v2788_v51  ;;  %v2828_v51 = vld [vmem:[%s3057_s14 + $0x1c8] ss:$16 sps:$4 sm:$0xff]  }
 0x18f   : > { %1779 = vmatmul.mubr.bf16.gmra.mrb[88].mxu1 %v2789_v54  ;;  %1915 = vmatprep.mubr.bf16.mxu0 %v2790_v46  ;;  %v2831_v54 = vld [vmem:[%s3057_s14 + $0x1e8] ss:$16 sps:$4 sm:$0xff]  }
 0x190   : > { %1786 = vmatprep.mubr.bf16.mxu1 %v2792_v59  ;;  %v1220_v59 = vadd.f32 %v3183_v8, %v3134_v31  ;;  %v1231_v31 = vadd.f32 %v3139_v34, %v3183_v8 }
 0x196   : > { %1916 = vmatmul.mubr.bf16.gmra.mrb[76].mxu0 %v2794_v11 }
 0x197   : > { %1787 = vmatmul.mubr.bf16.gmra.mrb[92].mxu1 %v2795_v12  ;;  %1923 = vmatprep.mubr.bf16.mxu0 %v2796_v13  ;;  %v1223_v12 = vadd.f32 %v3183_v8, %v3141_v41  ;;  %v1236_v41 = vadd.f32 %v3183_v8, %v3148_v53 }
 0x198   : > { %1794 = vmatprep.mubr.bf16.mxu1 %v2798_v16 }
 0x19e   : > { %1924 = vmatmul.mubr.bf16.gmra.mrb[80].mxu0 %v2800_v18 }
 0x19f   : > { %1795 = vmatmul.mubr.bf16.gmra.mrb[96].mxu1 %v2801_v21  ;;  %1931 = vmatprep.mubr.bf16.mxu0 %v2802_v26 }
 0x1a0   : > { %1802 = vmatprep.mubr.bf16.mxu1 %v2804_v30  ;;  %v1228_v30 = vadd.f32 %v3132_v27, %v3183_v8  ;;  %v1239_v27 = vadd.f32 %v3183_v8, %v3153_v43 }
 0x1a6   : > { %1932 = vmatmul.mubr.bf16.gmra.mrb[84].mxu0 %v2806_v32 }
 0x1a7   : > { %1803 = vmatmul.mubr.bf16.gmra.mrb[100].mxu1 %v2807_v33  ;;  %1939 = vmatprep.mubr.bf16.mxu0 %v2808_v36 }
 0x1a8   : > { %1810 = vmatprep.mubr.bf16.mxu1 %v2810_v40 }
 0x1ae   : > { %1940 = vmatmul.mubr.bf16.gmra.mrb[88].mxu0 %v2812_v42 }
 0x1af   : > { %1811 = vmatmul.mubr.bf16.gmra.mrb[104].mxu1 %v2813_v7  ;;  %1947 = vmatprep.mubr.bf16.mxu0 %v2814_v44 }
 0x1b0   : > { %1818 = vmatprep.mubr.bf16.mxu1 %v2816_v48 }
 0x1b6   : > { %1948 = vmatmul.mubr.bf16.gmra.mrb[92].mxu0 %v2818_v17 }
 0x1b7   : > { %1819 = vmatmul.mubr.bf16.gmra.mrb[108].mxu1 %v2819_v23  ;;  %1955 = vmatprep.mubr.bf16.mxu0 %v2820_v15 }
 0x1be   : > { %1956 = vmatmul.mubr.bf16.gmra.mrb[96].mxu0 %v2822_v22 }
 0x1bf   : > { %1963 = vmatprep.mubr.bf16.mxu0 %v2823_v25 }
 0x1c6   : > { %1964 = vmatmul.mubr.bf16.gmra.mrb[100].mxu0 %v2825_v29 }
 0x1c7   : > { %1971 = vmatprep.mubr.bf16.mxu0 %v2826_v37 }
 0x1ce   : > { %1972 = vmatmul.mubr.bf16.gmra.mrb[104].mxu0 %v2828_v51  ;;  %v1244_v51 = vadd.f32 %v3144_v49, %v3183_v8  ;;  %v1252_v49 = vadd.f32 %v3183_v8, %v3160_v58 }
 0x1cf   : > { %1979 = vmatprep.mubr.bf16.mxu0 %v2829_v52 }
 0x1d6   : > { %1980 = vmatmul.mubr.bf16.gmra.mrb[108].mxu0 %v2831_v54 }
 0x212   : > { %v2312_v46 = vpop.f32.mrb[48].mxu1 }
 0x213   : > { %v2313_v57 = vpop.f32.mrb[49].mxu1 }
 0x214   : > { %v2314_v0 = vadd.f32 %v2313_v57, %v2312_v46  ;;  %v2315_v4 = vpop.f32.mrb[50].mxu1  ;;  %v1247_v46 = vadd.f32 %v3151_v39, %v3183_v8 }
 0x215   : > { %v2316_v11 = vpop.f32.mrb[51].mxu1 }
 0x216   : > { %v1701_v13 = vadd.f32 %v2314_v0, %v1220_v59  ;;  %v2317_v16 = vadd.f32 %v2316_v11, %v2315_v4 }
 0x218   : > { %v1704_v18 = vadd.f32 %v2317_v16, %v1223_v12 }
 0x21a   : > { %v2318_v21 = vpop.f32.mrb[52].mxu1 }
 0x21b   : > { %v2319_v26 = vpop.f32.mrb[53].mxu1 }
 0x21c   : > { %v2320_v32 = vadd.f32 %v2319_v26, %v2318_v21  ;;  %v2321_v33 = vpop.f32.mrb[54].mxu1 }
 0x21d   : > { %v2322_v36 = vpop.f32.mrb[55].mxu1 }
 0x21e   : > { %v1709_v40 = vadd.f32 %v2320_v32, %v1228_v30  ;;  %v2323_v42 = vadd.f32 %v2322_v36, %v2321_v33 }
 0x220   : > { %v1712_v7 = vadd.f32 %v2323_v42, %v1231_v31  ;;  %v1255_v31 = vadd.f32 %v3183_v8, %v3165_v61 }
 0x222   : > { %v2324_v44 = vpop.f32.mrb[56].mxu1 }
 0x223   : > { %v2325_v48 = vpop.f32.mrb[57].mxu1 }
 0x224   : > { %v2326_v17 = vadd.f32 %v2325_v48, %v2324_v44  ;;  %v2327_v23 = vpop.f32.mrb[58].mxu1 }
 0x225   : > { %v2328_v15 = vpop.f32.mrb[59].mxu1 }
 0x226   : > { %v3286_v22 = vadd.f32 %v2326_v17, %v1236_v41  ;;  %v2329_v25 = vadd.f32 %v2328_v15, %v2327_v23 }
 0x228   : > { %v3288_v29 = vadd.f32 %v2329_v25, %v1239_v27  ;;  %v1260_v25 = vadd.f32 %v3156_v55, %v3183_v8 }
 0x22a   : > { %v2330_v34 = vpop.f32.mrb[60].mxu1 }
 0x22b   : > { %v2331_v37 = vpop.f32.mrb[61].mxu1 }
 0x22c   : > { %v2332_v52 = vadd.f32 %v2331_v37, %v2330_v34  ;;  %v2333_v54 = vpop.f32.mrb[62].mxu1 }
 0x22d   : > { %v2334_v53 = vpop.f32.mrb[63].mxu1 }
 0x22e   : > { %v3294_v57 = vadd.f32 %v2332_v52, %v1244_v51  ;;  %v2335_v59 = vadd.f32 %v2334_v53, %v2333_v54  ;;  %v1263_v54 = vadd.f32 %v3163_v60, %v3183_v8 }
 0x230   : > { %v3296_v43 = vadd.f32 %v2335_v59, %v1247_v46 }
 0x231   : > { %v2424_v0 = vpop.f32.mrb[48].mxu0 }
 0x232   : > { %v2425_v4 = vpop.f32.mrb[49].mxu0  ;;  %v2336_v11 = vpop.f32.mrb[64].mxu1 }
 0x233   : > { %v2426_v12 = vadd.f32 %v2425_v4, %v2424_v0  ;;  %v2427_v16 = vpop.f32.mrb[50].mxu0  ;;  %v2337_v21 = vpop.f32.mrb[65].mxu1 }
 0x234   : > { %v2428_v39 = vpop.f32.mrb[51].mxu0  ;;  %v2338_v26 = vadd.f32 %v2337_v21, %v2336_v11  ;;  %v2339_v30 = vpop.f32.mrb[66].mxu1  ;;  %v1268_v21 = vadd.f32 %v3183_v8, %v3172_v2 }
 0x235   : > { %v1862_v32 = vadd.f32 %v2426_v12, %v1701_v13  ;;  %v2429_v33 = vadd.f32 %v2428_v39, %v2427_v16  ;;  %v2340_v36 = vpop.f32.mrb[67].mxu1 }
 0x236   : > { %v3308_v42 = vadd.f32 %v2338_v26, %v1252_v49  ;;  %v2341_v44 = vadd.f32 %v2340_v36, %v2339_v30 }
 0x237   : > { %1988 = vst [vmem:[%s3304_s20] sm:$0xff] %v1862_v32  ;;  %v1865_v58 = vadd.f32 %v2429_v33, %v1704_v18  ;;  %v1271_v32 = vadd.f32 %v3183_v8, %v3177_v6  ;;  %v1276_v6 = vadd.f32 %v3168_v63, %v3183_v8 }
 0x238   : > { %v3311_v48 = vadd.f32 %v2341_v44, %v1255_v31 }
 0x239   : > { %1989 = vst [vmem:[%s3304_s20 + $0x8] sm:$0xff] %v1865_v58  ;;  %v2430_v41 = vpop.f32.mrb[52].mxu0 }
 0x23a   : > { %v2431_v17 = vpop.f32.mrb[53].mxu0  ;;  %v2342_v23 = vpop.f32.mrb[68].mxu1 }
 0x23b   : > { %v2432_v15 = vadd.f32 %v2431_v17, %v2430_v41  ;;  %v2433_v13 = vpop.f32.mrb[54].mxu0  ;;  %v2343_v27 = vpop.f32.mrb[69].mxu1 }
 0x23c   : > { %v2434_v61 = vpop.f32.mrb[55].mxu0  ;;  %v2344_v34 = vadd.f32 %v2343_v27, %v2342_v23  ;;  %v2345_v37 = vpop.f32.mrb[70].mxu1 }
 0x23d   : > { %v1870_v51 = vadd.f32 %v2432_v15, %v1709_v40  ;;  %v2435_v52 = vadd.f32 %v2434_v61, %v2433_v13  ;;  %v2346_v18 = vpop.f32.mrb[71].mxu1 }
 0x23e   : > { %v3318_v53 = vadd.f32 %v2344_v34, %v1260_v25  ;;  %v2347_v46 = vadd.f32 %v2346_v18, %v2345_v37  ;;  %v1279_v34 = vadd.f32 %v3175_v5, %v3183_v8 }
 0x23f   : > { %1990 = vst [vmem:[%s3304_s20 + $0x10] sm:$0xff] %v1870_v51  ;;  %v1873_v59 = vadd.f32 %v2435_v52, %v1712_v7 }
 0x240   : > { %v3321_v0 = vadd.f32 %v2347_v46, %v1263_v54 }
 0x241   : > { %1991 = vst [vmem:[%s3304_s20 + $0x18] sm:$0xff] %v1873_v59  ;;  %v2436_v4 = vpop.f32.mrb[56].mxu0 }
 0x242   : > { %v2437_v55 = vpop.f32.mrb[57].mxu0  ;;  %v2348_v11 = vpop.f32.mrb[72].mxu1 }
 0x243   : > { %v2438_v12 = vadd.f32 %v2437_v55, %v2436_v4  ;;  %v2439_v40 = vpop.f32.mrb[58].mxu0  ;;  %v2349_v16 = vpop.f32.mrb[73].mxu1 }
 0x244   : > { %v2440_v60 = vpop.f32.mrb[59].mxu0  ;;  %v2350_v49 = vadd.f32 %v2349_v16, %v2348_v11  ;;  %v2351_v39 = vpop.f32.mrb[74].mxu1 }
 0x245   : > { %v1878_v26 = vadd.f32 %v2438_v12, %v3286_v22  ;;  %v2441_v7 = vadd.f32 %v2440_v60, %v2439_v40  ;;  %v2352_v30 = vpop.f32.mrb[75].mxu1 }
 0x246   : > { %v3329_v33 = vadd.f32 %v2350_v49, %v1268_v21  ;;  %v2353_v36 = vadd.f32 %v2352_v30, %v2351_v39 }
 0x247   : > { %1992 = vst [vmem:[%s3304_s20 + $0x20] sm:$0xff] %v1878_v26  ;;  %v1881_v31 = vadd.f32 %v2441_v7, %v3288_v29 }
 0x248   : > { %v3333_v44 = vadd.f32 %v2353_v36, %v1271_v32 }
 0x249   : > { %1993 = vst [vmem:[%s3304_s20 + $0x28] sm:$0xff] %v1881_v31  ;;  %v2442_v2 = vpop.f32.mrb[60].mxu0 }
 0x24a   : > { %v2354_v58 = vpop.f32.mrb[76].mxu1  ;;  %v2443_v41 = vpop.f32.mrb[61].mxu0 }
 0x24b   : > { %v2444_v17 = vadd.f32 %v2443_v41, %v2442_v2  ;;  %v2355_v22 = vpop.f32.mrb[77].mxu1  ;;  %v2445_v23 = vpop.f32.mrb[62].mxu0 }
 0x24c   : > { %v2356_v15 = vadd.f32 %v2355_v22, %v2354_v58  ;;  %v2357_v13 = vpop.f32.mrb[78].mxu1  ;;  %v2446_v27 = vpop.f32.mrb[63].mxu0 }
 0x24d   : > { %v1886_v25 = vadd.f32 %v2444_v17, %v3294_v57  ;;  %v2447_v29 = vadd.f32 %v2446_v27, %v2445_v23  ;;  %v2358_v61 = vpop.f32.mrb[79].mxu1 }
 0x24e   : > { %v3341_v37 = vadd.f32 %v2356_v15, %v1276_v6  ;;  %v2359_v51 = vadd.f32 %v2358_v61, %v2357_v13 }
 0x24f   : > { %1994 = vst [vmem:[%s3304_s20 + $0x30] sm:$0xff] %v1886_v25  ;;  %v1889_v52 = vadd.f32 %v2447_v29, %v3296_v43 }
 0x250   : > { %v3345_v18 = vadd.f32 %v2359_v51, %v1279_v34 }
 0x251   : > { %1995 = vst [vmem:[%s3304_s20 + $0x38] sm:$0xff] %v1889_v52  ;;  %v2448_v63 = vpop.f32.mrb[64].mxu0 }
 0x252   : > { %v2360_v54 = vpop.f32.mrb[80].mxu1  ;;  %v2449_v46 = vpop.f32.mrb[65].mxu0 }
 0x253   : > { %v2450_v57 = vadd.f32 %v2449_v46, %v2448_v63  ;;  %v2361_v59 = vpop.f32.mrb[81].mxu1  ;;  %v2451_v4 = vpop.f32.mrb[66].mxu0 }
 0x254   : > { %v2362_v55 = vadd.f32 %v2361_v59, %v2360_v54  ;;  %v2363_v11 = vpop.f32.mrb[82].mxu1  ;;  %v2452_v5 = vpop.f32.mrb[67].mxu0 }
 0x255   : > { %v1894_v8 = vadd.f32 %v2450_v57, %v3308_v42  ;;  %v2453_v12 = vadd.f32 %v2452_v5, %v2451_v4  ;;  %v2364_v40 = vpop.f32.mrb[83].mxu1 }
 0x256   : > { %v3350_v43 = vadd.f32 %v2362_v55, %v3192_v20  ;;  %v2365_v16 = vadd.f32 %v2364_v40, %v2363_v11 }
 0x257   : > { %1996 = vst [vmem:[%s3304_s20 + $0x40] sm:$0xff] %v1894_v8  ;;  %v1897_v21 = vadd.f32 %v2453_v12, %v3311_v48 }
 0x258   : > { %v3355_v60 = vadd.f32 %v2365_v16, %v3198_v28 }
 0x259   : > { %1997 = vst [vmem:[%s3304_s20 + $0x48] sm:$0xff] %v1897_v21  ;;  %v2454_v49 = vpop.f32.mrb[68].mxu0 }
 0x25a   : > { %v2366_v39 = vpop.f32.mrb[84].mxu1  ;;  %v2455_v26 = vpop.f32.mrb[69].mxu0 }
 0x25b   : > { %v2456_v7 = vadd.f32 %v2455_v26, %v2454_v49  ;;  %v2367_v42 = vpop.f32.mrb[85].mxu1  ;;  %v2457_v30 = vpop.f32.mrb[70].mxu0 }
 0x25c   : > { %v2368_v32 = vadd.f32 %v2367_v42, %v2366_v39  ;;  %v2369_v36 = vpop.f32.mrb[86].mxu1  ;;  %v2458_v20 = vpop.f32.mrb[71].mxu0 }
 0x25d   : > { %v1902_v31 = vadd.f32 %v2456_v7, %v3318_v53  ;;  %v2459_v2 = vadd.f32 %v2458_v20, %v2457_v30  ;;  %v2370_v58 = vpop.f32.mrb[87].mxu1 }
 0x25e   : > { %v3360_v48 = vadd.f32 %v2368_v32, %v3188_v14  ;;  %v2371_v28 = vadd.f32 %v2370_v58, %v2369_v36 }
 0x25f   : > { %1998 = vst [vmem:[%s3304_s20 + $0x50] sm:$0xff] %v1902_v31  ;;  %v1905_v41 = vadd.f32 %v2459_v2, %v3321_v0 }
 0x260   : > { %v3365_v17 = vadd.f32 %v2371_v28, %v3195_v24 }
 0x261   : > { %1999 = vst [vmem:[%s3304_s20 + $0x58] sm:$0xff] %v1905_v41  ;;  %v2460_v22 = vpop.f32.mrb[72].mxu0 }
 0x262   : > { %v2372_v23 = vpop.f32.mrb[88].mxu1  ;;  %v2461_v6 = vpop.f32.mrb[73].mxu0 }
 0x263   : > { %v2462_v15 = vadd.f32 %v2461_v6, %v2460_v22  ;;  %v2373_v53 = vpop.f32.mrb[89].mxu1  ;;  %v2463_v13 = vpop.f32.mrb[74].mxu0 }
 0x264   : > { %v2374_v27 = vadd.f32 %v2373_v53, %v2372_v23  ;;  %v2375_v25 = vpop.f32.mrb[90].mxu1  ;;  %v2464_v14 = vpop.f32.mrb[75].mxu0 }
 0x265   : > { %v1910_v29 = vadd.f32 %v2462_v15, %v3329_v33  ;;  %v2465_v61 = vadd.f32 %v2464_v14, %v2463_v13  ;;  %v2376_v34 = vpop.f32.mrb[91].mxu1 }
 0x266   : > { %v3370_v0 = vadd.f32 %v2374_v27, %v3208_v3  ;;  %v2377_v24 = vadd.f32 %v2376_v34, %v2375_v25 }
 0x267   : > { %2000 = vst [vmem:[%s3304_s20 + $0x60] sm:$0xff] %v1910_v29  ;;  %v1913_v51 = vadd.f32 %v2465_v61, %v3333_v44 }
 0x268   : > { %v3375_v52 = vadd.f32 %v2377_v24, %v3214_v45 }
 0x269   : > { %2001 = vst [vmem:[%s3304_s20 + $0x68] sm:$0xff] %v1913_v51  ;;  %v2466_v63 = vpop.f32.mrb[76].mxu0 }
 0x26a   : > { %v2378_v54 = vpop.f32.mrb[92].mxu1  ;;  %v2467_v46 = vpop.f32.mrb[77].mxu0 }
 0x26b   : > { %v2468_v57 = vadd.f32 %v2467_v46, %v2466_v63  ;;  %v2379_v33 = vpop.f32.mrb[93].mxu1  ;;  %v2469_v59 = vpop.f32.mrb[78].mxu0 }
 0x26c   : > { %v2380_v4 = vadd.f32 %v2379_v33, %v2378_v54  ;;  %v2381_v55 = vpop.f32.mrb[94].mxu1  ;;  %v2470_v3 = vpop.f32.mrb[79].mxu0 }
 0x26d   : > { %v1918_v11 = vadd.f32 %v2468_v57, %v3341_v37  ;;  %v2471_v5 = vadd.f32 %v2470_v3, %v2469_v59  ;;  %v2382_v8 = vpop.f32.mrb[95].mxu1 }
 0x26e   : > { %v3380_v44 = vadd.f32 %v2380_v4, %v3204_v38  ;;  %v2383_v45 = vadd.f32 %v2382_v8, %v2381_v55 }
 0x26f   : > { %2002 = vst [vmem:[%s3304_s20 + $0x70] sm:$0xff] %v1918_v11  ;;  %v1921_v12 = vadd.f32 %v2471_v5, %v3345_v18 }
 0x270   : > { %v3385_v40 = vadd.f32 %v2383_v45, %v3211_v10 }
 0x271   : > { %2003 = vst [vmem:[%s3304_s20 + $0x78] sm:$0xff] %v1921_v12  ;;  %v2472_v16 = vpop.f32.mrb[80].mxu0 }
 0x272   : > { %v2384_v21 = vpop.f32.mrb[96].mxu1  ;;  %v2473_v49 = vpop.f32.mrb[81].mxu0 }
 0x273   : > { %v2474_v39 = vadd.f32 %v2473_v49, %v2472_v16  ;;  %v2385_v37 = vpop.f32.mrb[97].mxu1  ;;  %v2475_v26 = vpop.f32.mrb[82].mxu0 }
 0x274   : > { %v2386_v7 = vadd.f32 %v2385_v37, %v2384_v21  ;;  %v2387_v42 = vpop.f32.mrb[98].mxu1  ;;  %v2476_v38 = vpop.f32.mrb[83].mxu0 }
 0x275   : > { %v1926_v30 = vadd.f32 %v2474_v39, %v3350_v43  ;;  %v2477_v32 = vadd.f32 %v2476_v38, %v2475_v26  ;;  %v2388_v36 = vpop.f32.mrb[99].mxu1 }
 0x276   : > { %v3390_v18 = vadd.f32 %v2386_v7, %v3224_v50  ;;  %v2389_v10 = vadd.f32 %v2388_v36, %v2387_v42 }
 0x277   : > { %2004 = vst [vmem:[%s3304_s20 + $0x80] sm:$0xff] %v1926_v30  ;;  %v1929_v20 = vadd.f32 %v2477_v32, %v3355_v60 }
 0x278   : > { %v3395_v31 = vadd.f32 %v2389_v10, %v3230_v47 }
 0x279   : > { %2005 = vst [vmem:[%s3304_s20 + $0x88] sm:$0xff] %v1929_v20  ;;  %v2478_v2 = vpop.f32.mrb[84].mxu0 }
 0x27a   : > { %v2390_v58 = vpop.f32.mrb[100].mxu1  ;;  %v2479_v28 = vpop.f32.mrb[85].mxu0 }
 0x27b   : > { %v2480_v41 = vadd.f32 %v2479_v28, %v2478_v2  ;;  %v2391_v43 = vpop.f32.mrb[101].mxu1  ;;  %v2481_v22 = vpop.f32.mrb[86].mxu0 }
 0x27c   : > { %v2392_v23 = vadd.f32 %v2391_v43, %v2390_v58  ;;  %v2393_v6 = vpop.f32.mrb[102].mxu1  ;;  %v2482_v50 = vpop.f32.mrb[87].mxu0 }
 0x27d   : > { %v1934_v15 = vadd.f32 %v2480_v41, %v3360_v48  ;;  %v2483_v53 = vadd.f32 %v2482_v50, %v2481_v22  ;;  %v2394_v13 = vpop.f32.mrb[103].mxu1 }
 0x27e   : > { %v1805_v60 = vadd.f32 %v2392_v23, %v3220_v19  ;;  %v2395_v47 = vadd.f32 %v2394_v13, %v2393_v6 }
 0x27f   : > { %2006 = vst [vmem:[%s3304_s20 + $0x90] sm:$0xff] %v1934_v15  ;;  %v1937_v27 = vadd.f32 %v2483_v53, %v3365_v17 }
 0x280   : > { %v1808_v25 = vadd.f32 %v2395_v47, %v3227_v35 }
 0x281   : > { %2007 = vst [vmem:[%s3304_s20 + $0x98] sm:$0xff] %v1937_v27  ;;  %v2484_v14 = vpop.f32.mrb[88].mxu0 }
 0x282   : > { %v2396_v29 = vpop.f32.mrb[104].mxu1  ;;  %v2485_v61 = vpop.f32.mrb[89].mxu0 }
 0x283   : > { %v2486_v34 = vadd.f32 %v2485_v61, %v2484_v14  ;;  %v2397_v24 = vpop.f32.mrb[105].mxu1  ;;  %v2487_v51 = vpop.f32.mrb[90].mxu0 }
 0x284   : > { %v2398_v48 = vadd.f32 %v2397_v24, %v2396_v29  ;;  %v2399_v63 = vpop.f32.mrb[106].mxu1  ;;  %v2488_v54 = vpop.f32.mrb[91].mxu0 }
 0x285   : > { %v1942_v19 = vadd.f32 %v2486_v34, %v3370_v0  ;;  %v2489_v46 = vadd.f32 %v2488_v54, %v2487_v51  ;;  %v2400_v57 = vpop.f32.mrb[107].mxu1 }
 0x286   : > { %v1813_v17 = vadd.f32 %v2398_v48, %v3240_v62  ;;  %v2401_v33 = vadd.f32 %v2400_v57, %v2399_v63 }
 0x287   : > { %2008 = vst [vmem:[%s3304_s20 + $0xa0] sm:$0xff] %v1942_v19  ;;  %v1945_v35 = vadd.f32 %v2489_v46, %v3375_v52 }
 0x288   : > { %v1816_v59 = vadd.f32 %v2401_v33, %v3246_v9 }
 0x289   : > { %2009 = vst [vmem:[%s3304_s20 + $0xa8] sm:$0xff] %v1945_v35  ;;  %v2490_v4 = vpop.f32.mrb[92].mxu0 }
 0x28a   : > { %v2402_v55 = vpop.f32.mrb[108].mxu1  ;;  %v2491_v3 = vpop.f32.mrb[93].mxu0 }
 0x28b   : > { %v2492_v11 = vadd.f32 %v2491_v3, %v2490_v4  ;;  %v2403_v5 = vpop.f32.mrb[109].mxu1  ;;  %v2493_v8 = vpop.f32.mrb[94].mxu0 }
 0x28c   : > { %v2404_v0 = vadd.f32 %v2403_v5, %v2402_v55  ;;  %v2405_v45 = vpop.f32.mrb[110].mxu1  ;;  %v2494_v12 = vpop.f32.mrb[95].mxu0 }
 0x28d   : > { %v1950_v62 = vadd.f32 %v2492_v11, %v3380_v44  ;;  %v2495_v16 = vadd.f32 %v2494_v12, %v2493_v8  ;;  %v2406_v21 = vpop.f32.mrb[111].mxu1 }
 0x28e   : > { %v1821_v9 = vadd.f32 %v2404_v0, %v3236_v56  ;;  %v2407_v52 = vadd.f32 %v2406_v21, %v2405_v45 }
 0x28f   : > { %2010 = vst [vmem:[%s3304_s20 + $0xb0] sm:$0xff] %v1950_v62  ;;  %v1953_v49 = vadd.f32 %v2495_v16, %v3385_v40 }
 0x290   : > { %v1824_v39 = vadd.f32 %v2407_v52, %v3243_v1 }
 0x291   : > { %2011 = vst [vmem:[%s3304_s20 + $0xb8] sm:$0xff] %v1953_v49  ;;  %v2496_v37 = vpop.f32.mrb[96].mxu0 }
 0x292   : > { %v2497_v26 = vpop.f32.mrb[97].mxu0 }
 0x293   : > { %v2498_v7 = vadd.f32 %v2497_v26, %v2496_v37  ;;  %v2499_v42 = vpop.f32.mrb[98].mxu0 }
 0x294   : > { %v2500_v44 = vpop.f32.mrb[99].mxu0 }
 0x295   : > { %v1958_v38 = vadd.f32 %v2498_v7, %v3390_v18  ;;  %v2501_v30 = vadd.f32 %v2500_v44, %v2499_v42 }
 0x297   : > { %2012 = vst [vmem:[%s3304_s20 + $0xc0] sm:$0xff] %v1958_v38  ;;  %v1961_v56 = vadd.f32 %v2501_v30, %v3395_v31 }
 0x299   : > { %2013 = vst [vmem:[%s3304_s20 + $0xc8] sm:$0xff] %v1961_v56  ;;  %v2502_v32 = vpop.f32.mrb[100].mxu0 }
 0x29a   : > { %v2503_v36 = vpop.f32.mrb[101].mxu0 }
 0x29b   : > { %v2504_v40 = vadd.f32 %v2503_v36, %v2502_v32  ;;  %v2505_v1 = vpop.f32.mrb[102].mxu0 }
 0x29c   : > { %v2506_v10 = vpop.f32.mrb[103].mxu0 }
 0x29d   : > { %v1966_v20 = vadd.f32 %v2504_v40, %v1805_v60  ;;  %v2507_v2 = vadd.f32 %v2506_v10, %v2505_v1 }
 0x29f   : > { %2014 = vst [vmem:[%s3304_s20 + $0xd0] sm:$0xff] %v1966_v20  ;;  %v1969_v58 = vadd.f32 %v2507_v2, %v1808_v25 }
 0x2a1   : > { %2015 = vst [vmem:[%s3304_s20 + $0xd8] sm:$0xff] %v1969_v58  ;;  %v2508_v28 = vpop.f32.mrb[104].mxu0 }
 0x2a2   : > { %v2509_v41 = vpop.f32.mrb[105].mxu0 }
 0x2a3   : > { %v2510_v18 = vadd.f32 %v2509_v41, %v2508_v28  ;;  %v2511_v43 = vpop.f32.mrb[106].mxu0 }
 0x2a4   : > { %v2512_v31 = vpop.f32.mrb[107].mxu0 }
 0x2a5   : > { %v1974_v22 = vadd.f32 %v2510_v18, %v1813_v17  ;;  %v2513_v23 = vadd.f32 %v2512_v31, %v2511_v43 }
 0x2a7   : > { %2016 = vst [vmem:[%s3304_s20 + $0xe0] sm:$0xff] %v1974_v22  ;;  %v1977_v6 = vadd.f32 %v2513_v23, %v1816_v59 }
 0x2a9   : > { %2017 = vst [vmem:[%s3304_s20 + $0xe8] sm:$0xff] %v1977_v6  ;;  %v2514_v50 = vpop.f32.mrb[108].mxu0 }
 0x2aa   : > { %v2515_v15 = vpop.f32.mrb[109].mxu0 }
 0x2ab   : > { %v2516_v53 = vadd.f32 %v2515_v15, %v2514_v50  ;;  %v2517_v13 = vpop.f32.mrb[110].mxu0 }
 0x2ac   : > { %v2518_v60 = vpop.f32.mrb[111].mxu0 }
 0x2ad   : > { %v1982_v47 = vadd.f32 %v2516_v53, %v1821_v9  ;;  %v2519_v27 = vadd.f32 %v2518_v60, %v2517_v13 }
 0x2af   : > { %2018 = vst [vmem:[%s3304_s20 + $0xf0] sm:$0xff] %v1982_v47  ;;  %v1985_v25 = vadd.f32 %v2519_v27, %v1824_v39 }
 0x2b1   : > { %2019 = vst [vmem:[%s3304_s20 + $0xf8] sm:$0xff] %v1985_v25 }
 0x2b2 PF: > { %s16_s21 = sadd.s32 1, %s2838_s21  }
 0x2b3   : > { %p13_p4 = scmp.ge.s32.totalorder %s16_s21, 4  }
 0x2b5   :  { %15 = sbr.rel (!%p13_p4) target bundleno = 1 (0x1), region = 77 }

</bundles_post_ra>
